<compile_context>
chip_gen: v7x
topology: tpu7x:2x2x1
jax: 0.10.0
libtpu: 0.0.40
codegen_flags: <defaults>
</compile_context>

<pallas_src>
import functools

import jax
import jax.numpy as jnp
from jax.experimental import pallas as pl
from jax.experimental.pallas import tpu as pltpu

LANE = 128            # TPU lane width (last-dim padding target)
ROW_TILE = 256        # A_hat row tile (parallel axis)
K_TILE = 1024         # A_hat reduction tile (>=0.5 MiB bf16 per grid step)
RESIDENT_LIMIT = 12 * 1024 * 1024   # max bytes for a VMEM-resident X / H1
VMEM_LIMIT = 48 * 1024 * 1024       # <= v7x physical 64 MiB, leaves headroom


def _round_up(x, m):
    return (x + m - 1) // m * m


def _pad2(x, rows, cols):
    r, c = x.shape
    return jnp.pad(x, ((0, rows - r), (0, cols - c)))


def _plan_tiles(n, row_tile=ROW_TILE, k_tile=K_TILE):
    """Pick (n_pad, row_tile, k_tile) so both tiles divide n_pad and small
    graphs are NOT padded up to ROW_TILE."""
    n8 = _round_up(n, 8)
    if n8 <= row_tile:
        # single full-array block on both axes (block == array dims is legal)
        return n8, n8, n8
    kt = min(k_tile, _round_up(n8, row_tile))
    kt = max(row_tile, (kt // row_tile) * row_tile)   # multiple of row_tile
    n_pad = _round_up(n, kt)
    return n_pad, row_tile, kt


# ----------------------------- Pallas kernels ------------------------------

def _gcn1_kernel(a_ref, x_ref, w_ref, b_ref, h_ref, acc_ref, *,
                 k_tile, x_resident):
    """H1 = relu((A_hat @ X) @ W1 + b1), tiled over (row_tile_i, k_tile_k)."""
    k = pl.program_id(1)

    @pl.when(k == 0)
    def _():
        acc_ref[...] = jnp.zeros_like(acc_ref)

    if x_resident:
        # X lives in VMEM whole; slice the k-chunk locally (no HBM re-read).
        off = pl.multiple_of(k * k_tile, k_tile)
        x_blk = x_ref[pl.ds(off, k_tile), :]
    else:
        x_blk = x_ref[...]

    # Propagate first: inner dim is the (small, lane-padded) feature dim.
    acc_ref[...] += jnp.dot(a_ref[...], x_blk,
                            preferred_element_type=jnp.float32)

    @pl.when(k == pl.num_programs(1) - 1)
    def _():
        h = jnp.dot(acc_ref[...].astype(jnp.bfloat16), w_ref[...],
                    preferred_element_type=jnp.float32) + b_ref[...]
        h_ref[...] = jnp.maximum(h, 0.0).astype(h_ref.dtype)


def _gcn_heads_kernel(a_ref, h_ref, w_ref, b_ref, out_ref, acc_ref, *,
                      k_tile, h_resident):
    """Shared propagation P = A_hat @ H1, then one fused head matmul
    P @ [W_mu || W_logstd] + [b_mu || b_logstd]."""
    k = pl.program_id(1)

    @pl.when(k == 0)
    def _():
        acc_ref[...] = jnp.zeros_like(acc_ref)

    if h_resident:
        off = pl.multiple_of(k * k_tile, k_tile)
        h_blk = h_ref[pl.ds(off, k_tile), :]
    else:
        h_blk = h_ref[...]

    acc_ref[...] += jnp.dot(a_ref[...], h_blk,
                            preferred_element_type=jnp.float32)

    @pl.when(k == pl.num_programs(1) - 1)
    def _():
        out_ref[...] = (jnp.dot(acc_ref[...].astype(jnp.bfloat16), w_ref[...],
                                preferred_element_type=jnp.float32)
                        + b_ref[...]).astype(out_ref.dtype)


# ------------------------------ call wrappers -------------------------------

def _compiler_params():
    return pltpu.CompilerParams(
        dimension_semantics=("parallel", "arbitrary"),
        vmem_limit_bytes=VMEM_LIMIT,
    )


def gcn_layer1(a_p, x_p, w1, b1, *, row_tile, k_tile, x_resident):
    n_pad = a_p.shape[0]
    f_pad = x_p.shape[1]
    d_pad = w1.shape[1]
    grid = (n_pad // row_tile, n_pad // k_tile)

    x_reads = 1 if x_resident else grid[0]
    flops = 2 * n_pad * n_pad * f_pad + 2 * n_pad * f_pad * d_pad
    bytes_accessed = (a_p.size * 2                      # A_hat bf16, once
                      + x_p.size * 2 * x_reads          # X bf16
                      + w1.size * 2 + b1.size * 4
                      + n_pad * d_pad * 2)              # H1 out bf16

    if x_resident:
        x_spec = pl.BlockSpec((n_pad, f_pad), lambda i, k: (0, 0))
    else:
        x_spec = pl.BlockSpec((k_tile, f_pad), lambda i, k: (k, 0))

    kernel = functools.partial(_gcn1_kernel, k_tile=k_tile,
                               x_resident=x_resident)

    return pl.pallas_call(
        kernel,
        out_shape=jax.ShapeDtypeStruct((n_pad, d_pad), jnp.bfloat16),
        grid_spec=pltpu.PrefetchScalarGridSpec(
            num_scalar_prefetch=0,
            grid=grid,
            in_specs=[
                pl.BlockSpec((row_tile, k_tile), lambda i, k: (i, k)),  # A_hat
                x_spec,                                                  # X
                pl.BlockSpec((f_pad, d_pad), lambda i, k: (0, 0)),       # W1
                pl.BlockSpec((1, d_pad), lambda i, k: (0, 0)),           # b1
            ],
            out_specs=pl.BlockSpec((row_tile, d_pad), lambda i, k: (i, 0)),
            scratch_shapes=[pltpu.VMEM((row_tile, f_pad), jnp.float32)],
        ),
        compiler_params=_compiler_params(),
        cost_estimate=pl.CostEstimate(flops=flops, transcendentals=0,
                                      bytes_accessed=bytes_accessed),
    )(a_p, x_p, w1, b1)


def gcn_heads(a_p, h1, w_heads, b_heads, *, row_tile, k_tile, h_resident):
    n_pad = a_p.shape[0]
    d_pad = h1.shape[1]
    o_pad = w_heads.shape[1]            # 2 * h_pad (mu || logstd)
    grid = (n_pad // row_tile, n_pad // k_tile)

    h_reads = 1 if h_resident else grid[0]
    flops = 2 * n_pad * n_pad * d_pad + 2 * n_pad * d_pad * o_pad
    bytes_accessed = (a_p.size * 2
                      + h1.size * 2 * h_reads
                      + w_heads.size * 2 + b_heads.size * 4
                      + n_pad * o_pad * 4)

    if h_resident:
        h_spec = pl.BlockSpec((n_pad, d_pad), lambda i, k: (0, 0))
    else:
        h_spec = pl.BlockSpec((k_tile, d_pad), lambda i, k: (k, 0))

    kernel = functools.partial(_gcn_heads_kernel, k_tile=k_tile,
                               h_resident=h_resident)

    return pl.pallas_call(
        kernel,
        out_shape=jax.ShapeDtypeStruct((n_pad, o_pad), jnp.float32),
        grid_spec=pltpu.PrefetchScalarGridSpec(
            num_scalar_prefetch=0,
            grid=grid,
            in_specs=[
                pl.BlockSpec((row_tile, k_tile), lambda i, k: (i, k)),   # A_hat
                h_spec,                                                   # H1
                pl.BlockSpec((d_pad, o_pad), lambda i, k: (0, 0)),        # W_mu||W_ls
                pl.BlockSpec((1, o_pad), lambda i, k: (0, 0)),            # b_mu||b_ls
            ],
            out_specs=pl.BlockSpec((row_tile, o_pad), lambda i, k: (i, 0)),
            scratch_shapes=[pltpu.VMEM((row_tile, d_pad), jnp.float32)],
        ),
        compiler_params=_compiler_params(),
        cost_estimate=pl.CostEstimate(flops=flops, transcendentals=0,
                                      bytes_accessed=bytes_accessed),
    )(a_p, h1, w_heads, b_heads)


# ------------------------------- glue (JAX) --------------------------------

def build_norm_adj(edge_index, num_nodes):
    """Dense GCN-normalized adjacency with add_remaining_self_loops semantics."""
    src, dst = edge_index[0], edge_index[1]
    a = jnp.zeros((num_nodes, num_nodes), jnp.float32).at[dst, src].add(1.0)
    diag = jnp.diagonal(a)
    a = a + jnp.diag(jnp.where(diag == 0.0, 1.0, 0.0))   # only where missing
    deg = jnp.sum(a, axis=1)
    dinv = jnp.where(deg > 0.0, jax.lax.rsqrt(deg), 0.0)
    return a * dinv[:, None] * dinv[None, :]


def prepare_graph(edge_index, num_nodes, *, row_tile=ROW_TILE, k_tile=K_TILE):
    """Once-per-graph: normalized adjacency, padding, bf16 cast (hoisted out
    of the jitted forward so the 4N^2-byte pad/cast is not paid every call)."""
    n_pad, rt, kt = _plan_tiles(num_nodes, row_tile, k_tile)
    a_hat = build_norm_adj(edge_index, num_nodes)
    a_p = _pad2(a_hat, n_pad, n_pad).astype(jnp.bfloat16)
    return jax.device_put(a_p), (n_pad, rt, kt)


@functools.partial(jax.jit, static_argnames=("row_tile", "k_tile"))
def vgae_encoder_forward(params, x, a_p, *, row_tile, k_tile):
    """(mu, logstd) = VariationalGCNEncoder(x, edge_index) with dense A_hat."""
    n, f = x.shape
    n_pad = a_p.shape[0]
    two_h = params["w1"].shape[1]
    h_dim = params["w_mu"].shape[1]

    f_pad = _round_up(f, LANE)
    d_pad = _round_up(two_h, LANE)
    h_pad = _round_up(h_dim, LANE)

    # Lane-dense, zero-padded kernel-facing layout; matmul operands in bf16.
    x_p = _pad2(x, n_pad, f_pad).astype(jnp.bfloat16)
    w1 = _pad2(params["w1"], f_pad, d_pad).astype(jnp.bfloat16)
    b1 = _pad2(params["b1"], 1, d_pad)
    w_heads = jnp.concatenate(
        [_pad2(params["w_mu"], d_pad, h_pad),
         _pad2(params["w_logstd"], d_pad, h_pad)], axis=1).astype(jnp.bfloat16)
    b_heads = jnp.concatenate(
        [_pad2(params["b_mu"], 1, h_pad),
         _pad2(params["b_logstd"], 1, h_pad)], axis=1)

    # Keep X / H1 VMEM-resident when small enough (x2 for double-buffering).
    x_resident = 2 * n_pad * f_pad * 2 <= RESIDENT_LIMIT
    h_resident = 2 * n_pad * d_pad * 2 <= RESIDENT_LIMIT

    h1 = gcn_layer1(a_p, x_p, w1, b1, row_tile=row_tile, k_tile=k_tile,
                    x_resident=x_resident)                       # [n_pad, d_pad] bf16
    heads = gcn_heads(a_p, h1, w_heads, b_heads, row_tile=row_tile,
                      k_tile=k_tile, h_resident=h_resident)      # [n_pad, 2*h_pad] f32

    mu = heads[:n, :h_dim]
    logstd = heads[:n, h_pad:h_pad + h_dim]
    return mu, logstd


def _glorot(key, shape):
    fan_in, fan_out = shape
    a = (6.0 / (fan_in + fan_out)) ** 0.5
    return jax.random.uniform(key, shape, jnp.float32, -a, a)


def init_params(key, num_feature, num_hidden):
    k = jax.random.split(key, 3)
    return {
        # GCNConv(F, 2H): glorot weight, zero bias
        "w1": _glorot(k[0], (num_feature, 2 * num_hidden)),
        "b1": jnp.zeros((1, 2 * num_hidden), jnp.float32),
        # GCNConv(2H, H) — mu head
        "w_mu": _glorot(k[1], (2 * num_hidden, num_hidden)),
        "b_mu": jnp.zeros((1, num_hidden), jnp.float32),
        # GCNConv(2H, H) — logstd head
        "w_logstd": _glorot(k[2], (2 * num_hidden, num_hidden)),
        "b_logstd": jnp.zeros((1, num_hidden), jnp.float32),
    }


if __name__ == "__main__":
    N_NODES = 16        # nodes
    NUM_FEATURE = 8     # args.num_feature
    NUM_HIDDEN = 32     # args.num_hidden
    N_EDGES = 32

    key = jax.random.PRNGKey(0)
    kx, ke, kp = jax.random.split(key, 3)

    x = jax.random.normal(kx, (N_NODES, NUM_FEATURE), jnp.float32)
    edge_index = jax.random.randint(ke, (2, N_EDGES), 0, N_NODES)
    params = init_params(kp, NUM_FEATURE, NUM_HIDDEN)

    # Once-per-graph preprocessing (pad + bf16 cast hoisted out of forward).
    a_p, (n_pad, row_tile, k_tile) = prepare_graph(edge_index, N_NODES)

    mu, logstd = vgae_encoder_forward(params, x, a_p,
                                      row_tile=row_tile, k_tile=k_tile)
    jax.block_until_ready((mu, logstd))

    # Pure-JAX f32 reference.
    a_hat = build_norm_adj(edge_index, N_NODES)
    h1_ref = jnp.maximum(a_hat @ (x @ params["w1"]) + params["b1"], 0.0)
    mu_ref = a_hat @ h1_ref @ params["w_mu"] + params["b_mu"]
    ls_ref = a_hat @ h1_ref @ params["w_logstd"] + params["b_logstd"]

    assert mu.shape == (N_NODES, NUM_HIDDEN)
    assert logstd.shape == (N_NODES, NUM_HIDDEN)
    assert bool(jnp.all(jnp.isfinite(mu)))
    assert bool(jnp.all(jnp.isfinite(logstd)))
    assert bool(jnp.allclose(mu, mu_ref, atol=5e-2, rtol=5e-2))
    assert bool(jnp.allclose(logstd, ls_ref, atol=5e-2, rtol=5e-2))

    print("KERNEL_OK")
</pallas_src>

<mosaic_0001>
module attributes {stable_mosaic.version = 11 : i64} {
  func.func @_gcn1_kernel(%arg0: i32, %arg1: i32, %arg2: memref<16x16xbf16, #tpu.memory_space<vmem>>, %arg3: memref<16x128xbf16, #tpu.memory_space<vmem>>, %arg4: memref<128x128xbf16, #tpu.memory_space<vmem>>, %arg5: memref<1x128xf32, #tpu.memory_space<vmem>>, %arg6: memref<16x128xbf16, #tpu.memory_space<vmem>>, %arg7: memref<16x128xf32, #tpu.memory_space<vmem>>) attributes {dimension_semantics = [#tpu.dimension_semantics<parallel>, #tpu.dimension_semantics<arbitrary>], iteration_bounds = array<i64: 1, 1>, scalar_prefetch = 0 : i64, scratch_operands = 1 : i64, tpu.core_type = #tpu.core_type<tc>, window_params = [{transform_indices = @transform_0, window_bounds = array<i64: 16, 16>}, {pipeline_mode = #tpu.pipeline_mode<synchronous>, transform_indices = @transform_1, window_bounds = array<i64: 16, 128>}, {pipeline_mode = #tpu.pipeline_mode<synchronous>, transform_indices = @transform_2, window_bounds = array<i64: 128, 128>}, {pipeline_mode = #tpu.pipeline_mode<synchronous>, transform_indices = @transform_3, window_bounds = array<i64: 1, 128>}, {transform_indices = @transform_4, window_bounds = array<i64: 16, 128>}]} {
    %c0_i32 = arith.constant 0 : i32
    %0 = arith.cmpi eq, %arg1, %c0_i32 : i32
    %1 = arith.extui %0 : i1 to i32
    %c0_i32_0 = arith.constant 0 : i32
    %2 = arith.cmpi ne, %1, %c0_i32_0 : i32
    scf.if %2 {
      %cst_9 = arith.constant 0.000000e+00 : f32
      %15 = vector.broadcast %cst_9 : f32 to vector<16x128xf32>
      %c0_10 = arith.constant 0 : index
      %c0_11 = arith.constant 0 : index
      %16 = vector.load %arg7[%c0_10, %c0_11] : memref<16x128xf32, #tpu.memory_space<vmem>>, vector<16x128xf32>
      tpu.vector_store %arg7[%c0_10, %c0_11], %15 {strides = array<i32>} : memref<16x128xf32, #tpu.memory_space<vmem>>, vector<16x128xf32>,
    } else {
    }
    %c16_i32 = arith.constant 16 : i32
    %3 = arith.muli %arg1, %c16_i32 : i32
    %4 = tpu.assume_multiple %3, 16 : i32
    %5 = arith.index_cast %4 : i32 to index
    %c0 = arith.constant 0 : index
    %6 = vector.load %arg3[%5, %c0] : memref<16x128xbf16, #tpu.memory_space<vmem>>, vector<16x128xbf16>
    %c0_1 = arith.constant 0 : index
    %c0_2 = arith.constant 0 : index
    %7 = vector.load %arg7[%c0_1, %c0_2] : memref<16x128xf32, #tpu.memory_space<vmem>>, vector<16x128xf32>
    %c0_3 = arith.constant 0 : index
    %c0_4 = arith.constant 0 : index
    %8 = vector.load %arg2[%c0_3, %c0_4] : memref<16x16xbf16, #tpu.memory_space<vmem>>, vector<16x16xbf16>
    %cst = arith.constant dense<0.000000e+00> : vector<16x128xf32>
    %9 = tpu.matmul %8, %6, %cst {dimension_numbers = #tpu.dot_dimension_numbers<[1], [0], [0], [1], [0, 0, 1, 1], [], []>} : vector<16x16xbf16>, vector<16x128xbf16>, vector<16x128xf32> -> vector<16x128xf32>
    %10 = arith.addf %7, %9 : vector<16x128xf32>
    %c0_5 = arith.constant 0 : index
    %c0_6 = arith.constant 0 : index
    %11 = vector.load %arg7[%c0_5, %c0_6] : memref<16x128xf32, #tpu.memory_space<vmem>>, vector<16x128xf32>
    tpu.vector_store %arg7[%c0_5, %c0_6], %10 {strides = array<i32>} : memref<16x128xf32, #tpu.memory_space<vmem>>, vector<16x128xf32>,
    %c0_i32_7 = arith.constant 0 : i32
    %12 = arith.cmpi eq, %arg1, %c0_i32_7 : i32
    %13 = arith.extui %12 : i1 to i32
    %c0_i32_8 = arith.constant 0 : i32
    %14 = arith.cmpi ne, %13, %c0_i32_8 : i32
    scf.if %14 {
      %c0_9 = arith.constant 0 : index
      %c0_10 = arith.constant 0 : index
      %15 = vector.load %arg7[%c0_9, %c0_10] : memref<16x128xf32, #tpu.memory_space<vmem>>, vector<16x128xf32>
      %16 = arith.truncf %15 : vector<16x128xf32> to vector<16x128xbf16>
      %c0_11 = arith.constant 0 : index
      %c0_12 = arith.constant 0 : index
      %17 = vector.load %arg4[%c0_11, %c0_12] : memref<128x128xbf16, #tpu.memory_space<vmem>>, vector<128x128xbf16>
      %cst_13 = arith.constant dense<0.000000e+00> : vector<16x128xf32>
      %18 = tpu.matmul %16, %17, %cst_13 {dimension_numbers = #tpu.dot_dimension_numbers<[1], [0], [0], [1], [0, 0, 1, 1], [], []>} : vector<16x128xbf16>, vector<128x128xbf16>, vector<16x128xf32> -> vector<16x128xf32>
      %c0_14 = arith.constant 0 : index
      %c0_15 = arith.constant 0 : index
      %19 = vector.load %arg5[%c0_14, %c0_15] : memref<1x128xf32, #tpu.memory_space<vmem>>, vector<1x128xf32>
      %20 = vector.broadcast %19 : vector<1x128xf32> to vector<16x128xf32>
      %21 = arith.addf %18, %20 : vector<16x128xf32>
      %cst_16 = arith.constant 0.000000e+00 : f32
      %22 = vector.broadcast %cst_16 : f32 to vector<16x128xf32>
      %23 = arith.maximumf %21, %22 : vector<16x128xf32>
      %24 = arith.truncf %23 : vector<16x128xf32> to vector<16x128xbf16>
      %c0_17 = arith.constant 0 : index
      %c0_18 = arith.constant 0 : index
      %25 = vector.load %arg6[%c0_17, %c0_18] : memref<16x128xbf16, #tpu.memory_space<vmem>>, vector<16x128xbf16>
      tpu.vector_store %arg6[%c0_17, %c0_18], %24 {strides = array<i32>} : memref<16x128xbf16, #tpu.memory_space<vmem>>, vector<16x128xbf16>,
    } else {
    }
    return
  }
  func.func @transform_0(%arg0: i32, %arg1: i32) -> (i32, i32) {
    %c0_i32 = arith.constant 0 : i32
    return %arg0, %arg1 : i32, i32
  }
  func.func @transform_1(%arg0: i32, %arg1: i32) -> (i32, i32) {
    %c0_i32 = arith.constant 0 : i32
    %c0_i32_0 = arith.constant 0 : i32
    %c0_i32_1 = arith.constant 0 : i32
    return %c0_i32, %c0_i32_0 : i32, i32
  }
  func.func @transform_2(%arg0: i32, %arg1: i32) -> (i32, i32) {
    %c0_i32 = arith.constant 0 : i32
    %c0_i32_0 = arith.constant 0 : i32
    %c0_i32_1 = arith.constant 0 : i32
    return %c0_i32, %c0_i32_0 : i32, i32
  }
  func.func @transform_3(%arg0: i32, %arg1: i32) -> (i32, i32) {
    %c0_i32 = arith.constant 0 : i32
    %c0_i32_0 = arith.constant 0 : i32
    %c0_i32_1 = arith.constant 0 : i32
    return %c0_i32, %c0_i32_0 : i32, i32
  }
  func.func @transform_4(%arg0: i32, %arg1: i32) -> (i32, i32) {
    %c0_i32 = arith.constant 0 : i32
    %c0_i32_0 = arith.constant 0 : i32
    return %arg0, %c0_i32 : i32, i32
  }
}

module attributes {stable_mosaic.version = 11 : i64} {
  func.func @_gcn_heads_kernel(%arg0: i32, %arg1: i32, %arg2: memref<16x16xbf16, #tpu.memory_space<vmem>>, %arg3: memref<16x128xbf16, #tpu.memory_space<vmem>>, %arg4: memref<128x256xbf16, #tpu.memory_space<vmem>>, %arg5: memref<1x256xf32, #tpu.memory_space<vmem>>, %arg6: memref<16x256xf32, #tpu.memory_space<vmem>>, %arg7: memref<16x128xf32, #tpu.memory_space<vmem>>) attributes {dimension_semantics = [#tpu.dimension_semantics<parallel>, #tpu.dimension_semantics<arbitrary>], iteration_bounds = array<i64: 1, 1>, scalar_prefetch = 0 : i64, scratch_operands = 1 : i64, tpu.core_type = #tpu.core_type<tc>, window_params = [{transform_indices = @transform_0, window_bounds = array<i64: 16, 16>}, {pipeline_mode = #tpu.pipeline_mode<synchronous>, transform_indices = @transform_1, window_bounds = array<i64: 16, 128>}, {pipeline_mode = #tpu.pipeline_mode<synchronous>, transform_indices = @transform_2, window_bounds = array<i64: 128, 256>}, {pipeline_mode = #tpu.pipeline_mode<synchronous>, transform_indices = @transform_3, window_bounds = array<i64: 1, 256>}, {transform_indices = @transform_4, window_bounds = array<i64: 16, 256>}]} {
    %c0_i32 = arith.constant 0 : i32
    %0 = arith.cmpi eq, %arg1, %c0_i32 : i32
    %1 = arith.extui %0 : i1 to i32
    %c0_i32_0 = arith.constant 0 : i32
    %2 = arith.cmpi ne, %1, %c0_i32_0 : i32
    scf.if %2 {
      %cst_9 = arith.constant 0.000000e+00 : f32
      %15 = vector.broadcast %cst_9 : f32 to vector<16x128xf32>
      %c0_10 = arith.constant 0 : index
      %c0_11 = arith.constant 0 : index
      %16 = vector.load %arg7[%c0_10, %c0_11] : memref<16x128xf32, #tpu.memory_space<vmem>>, vector<16x128xf32>
      tpu.vector_store %arg7[%c0_10, %c0_11], %15 {strides = array<i32>} : memref<16x128xf32, #tpu.memory_space<vmem>>, vector<16x128xf32>,
    } else {
    }
    %c16_i32 = arith.constant 16 : i32
    %3 = arith.muli %arg1, %c16_i32 : i32
    %4 = tpu.assume_multiple %3, 16 : i32
    %5 = arith.index_cast %4 : i32 to index
    %c0 = arith.constant 0 : index
    %6 = vector.load %arg3[%5, %c0] : memref<16x128xbf16, #tpu.memory_space<vmem>>, vector<16x128xbf16>
    %c0_1 = arith.constant 0 : index
    %c0_2 = arith.constant 0 : index
    %7 = vector.load %arg7[%c0_1, %c0_2] : memref<16x128xf32, #tpu.memory_space<vmem>>, vector<16x128xf32>
    %c0_3 = arith.constant 0 : index
    %c0_4 = arith.constant 0 : index
    %8 = vector.load %arg2[%c0_3, %c0_4] : memref<16x16xbf16, #tpu.memory_space<vmem>>, vector<16x16xbf16>
    %cst = arith.constant dense<0.000000e+00> : vector<16x128xf32>
    %9 = tpu.matmul %8, %6, %cst {dimension_numbers = #tpu.dot_dimension_numbers<[1], [0], [0], [1], [0, 0, 1, 1], [], []>} : vector<16x16xbf16>, vector<16x128xbf16>, vector<16x128xf32> -> vector<16x128xf32>
    %10 = arith.addf %7, %9 : vector<16x128xf32>
    %c0_5 = arith.constant 0 : index
    %c0_6 = arith.constant 0 : index
    %11 = vector.load %arg7[%c0_5, %c0_6] : memref<16x128xf32, #tpu.memory_space<vmem>>, vector<16x128xf32>
    tpu.vector_store %arg7[%c0_5, %c0_6], %10 {strides = array<i32>} : memref<16x128xf32, #tpu.memory_space<vmem>>, vector<16x128xf32>,
    %c0_i32_7 = arith.constant 0 : i32
    %12 = arith.cmpi eq, %arg1, %c0_i32_7 : i32
    %13 = arith.extui %12 : i1 to i32
    %c0_i32_8 = arith.constant 0 : i32
    %14 = arith.cmpi ne, %13, %c0_i32_8 : i32
    scf.if %14 {
      %c0_9 = arith.constant 0 : index
      %c0_10 = arith.constant 0 : index
      %15 = vector.load %arg7[%c0_9, %c0_10] : memref<16x128xf32, #tpu.memory_space<vmem>>, vector<16x128xf32>
      %16 = arith.truncf %15 : vector<16x128xf32> to vector<16x128xbf16>
      %c0_11 = arith.constant 0 : index
      %c0_12 = arith.constant 0 : index
      %17 = vector.load %arg4[%c0_11, %c0_12] : memref<128x256xbf16, #tpu.memory_space<vmem>>, vector<128x256xbf16>
      %cst_13 = arith.constant dense<0.000000e+00> : vector<16x256xf32>
      %18 = tpu.matmul %16, %17, %cst_13 {dimension_numbers = #tpu.dot_dimension_numbers<[1], [0], [0], [1], [0, 0, 1, 1], [], []>} : vector<16x128xbf16>, vector<128x256xbf16>, vector<16x256xf32> -> vector<16x256xf32>
      %c0_14 = arith.constant 0 : index
      %c0_15 = arith.constant 0 : index
      %19 = vector.load %arg5[%c0_14, %c0_15] : memref<1x256xf32, #tpu.memory_space<vmem>>, vector<1x256xf32>
      %20 = vector.broadcast %19 : vector<1x256xf32> to vector<16x256xf32>
      %21 = arith.addf %18, %20 : vector<16x256xf32>
      %c0_16 = arith.constant 0 : index
      %c0_17 = arith.constant 0 : index
      %22 = vector.load %arg6[%c0_16, %c0_17] : memref<16x256xf32, #tpu.memory_space<vmem>>, vector<16x256xf32>
      tpu.vector_store %arg6[%c0_16, %c0_17], %21 {strides = array<i32>} : memref<16x256xf32, #tpu.memory_space<vmem>>, vector<16x256xf32>,
    } else {
    }
    return
  }
  func.func @transform_0(%arg0: i32, %arg1: i32) -> (i32, i32) {
    %c0_i32 = arith.constant 0 : i32
    return %arg0, %arg1 : i32, i32
  }
  func.func @transform_1(%arg0: i32, %arg1: i32) -> (i32, i32) {
    %c0_i32 = arith.constant 0 : i32
    %c0_i32_0 = arith.constant 0 : i32
    %c0_i32_1 = arith.constant 0 : i32
    return %c0_i32, %c0_i32_0 : i32, i32
  }
  func.func @transform_2(%arg0: i32, %arg1: i32) -> (i32, i32) {
    %c0_i32 = arith.constant 0 : i32
    %c0_i32_0 = arith.constant 0 : i32
    %c0_i32_1 = arith.constant 0 : i32
    return %c0_i32, %c0_i32_0 : i32, i32
  }
  func.func @transform_3(%arg0: i32, %arg1: i32) -> (i32, i32) {
    %c0_i32 = arith.constant 0 : i32
    %c0_i32_0 = arith.constant 0 : i32
    %c0_i32_1 = arith.constant 0 : i32
    return %c0_i32, %c0_i32_0 : i32, i32
  }
  func.func @transform_4(%arg0: i32, %arg1: i32) -> (i32, i32) {
    %c0_i32 = arith.constant 0 : i32
    %c0_i32_0 = arith.constant 0 : i32
    return %arg0, %c0_i32 : i32, i32
  }
}

</mosaic_0001>

<bundles_post_ra>
// kernel: vgae_encoder_forward.2
= control target key start
LH: loop header
LB: loop body
LE: loop exit
PB: predicated region body
PF: predicated region fallthrough
CT: control target
= control target key end

     0   :  { %v301_v0 = vmov 0.0   ;;  %vm302_vm0 = vmmov 0   ;;  %vm46_vm1 = vcmask 130048   ;;  %s364_s1 = inlined_call_operand.vmem [shape: bf16[16,128], index: 1, kind: input, shape index: {}]   ;;  %s365_s0 = inlined_call_operand.vmem [shape: bf16[16,16], index: 0, kind: input, shape index: {}]   ;;  %s366_s2 = inlined_call_operand.vmem [shape: bf16[128,128], index: 2, kind: input, shape index: {}]   ;;  %s367_s3 = inlined_call_operand.vmem [shape: f32[1,128], index: 3, kind: input, shape index: {}]   ;;  %s368_s4 = inlined_call_operand.vmem [shape: bf16[16,128], index: 4, kind: output, shape index: {}]  }
   0x1   :  { %263 = vmatprep.subr.bf16.mxu0 %v301_v0  ;;  %v291_v1 = vld [vmem:[%s364_s1] sm:$0xff]   ;;  %265 = vmatprep.mubr.msk.bf16.mxu0 %vm302_vm0, %v301_v0  ;;  %v294_v4 = vld [vmem:[%s366_s2 + $0x8] sm:$0xff]   ;;  %v295_v5 = vld [vmem:[%s366_s2 + $0x10] sm:$0xff]  }
   0x2   :  { %v292_v2 = vld [vmem:[%s365_s0] sm:$0xff]   ;;  %269 = vmatprep.subr.bf16.mxu1 %v301_v0  ;;  %285 = vmatprep.mubr.msk.bf16.mxu1 %vm302_vm0, %v301_v0  ;;  %v296_v6 = vld [vmem:[%s366_s2 + $0x18] sm:$0xff]   ;;  %v298_v8 = vld [vmem:[%s366_s2 + $0x28] sm:$0xff]  }
   0x3   :  { %264 = vmatpush3.bf16.msra.mxu0 %v291_v1  ;;  %v293_v3 = vld [vmem:[%s366_s2] sm:$0xff]   ;;  %v299_v9 = vld [vmem:[%s366_s2 + $0x30] sm:$0xff]   ;;  %v300_v10 = vld [vmem:[%s366_s2 + $0x38] sm:$0xff]  }
   0x4   :  { %270 = vmatpush3.bf16.msra.mxu1 %v293_v3  ;;  %v297_v7 = vld [vmem:[%s366_s2 + $0x20] sm:$0xff]  }
   0x5   :  { %271 = vmatprep.subr.bf16.mxu1 %v301_v0  ;;  %v234_v16 = vld [vmem:[%s367_s3] ss:$0 sm:$0xff] }
   0x6   :  { %266 = vmatmul.mubr.msk.bf16.vlgmr.msra.gmra.mrb[0].mxu0 %vm46_vm1, %v292_v2 }
   0x8   :  { %272 = vmatpush3.bf16.msra.mxu1 %v294_v4 }
   0x9   :  { %273 = vmatprep.subr.bf16.mxu1 %v301_v0 }
   0xc   :  { %274 = vmatpush3.bf16.msra.mxu1 %v295_v5 }
   0xd   :  { %275 = vmatprep.subr.bf16.mxu1 %v301_v0 }
  0x10   :  { %276 = vmatpush3.bf16.msra.mxu1 %v296_v6 }
  0x11   :  { %277 = vmatprep.subr.bf16.mxu1 %v301_v0 }
  0x14   :  { %278 = vmatpush3.bf16.msra.mxu1 %v297_v7 }
  0x15   :  { %279 = vmatprep.subr.bf16.mxu1 %v301_v0 }
  0x18   :  { %280 = vmatpush3.bf16.msra.mxu1 %v298_v8 }
  0x19   :  { %281 = vmatprep.subr.bf16.mxu1 %v301_v0 }
  0x1c   :  { %282 = vmatpush3.bf16.msra.mxu1 %v299_v9 }
  0x1d   :  { %283 = vmatprep.subr.bf16.mxu1 %v301_v0 }
  0x20   :  { %284 = vmatpush3.bf16.msra.mxu1 %v300_v10 }
  0xd9   :  { %v84_v11 = vpop.f32.mrb[0].mxu0 }
  0xda   :  { %v267_v12 = vpop.f32.mrb[1].mxu0 }
  0xdb   :  { %v87_v13 = vpop.f32.mrb[2].mxu0 }
  0xdc   :  { %v100_v14 = vpack.c.bf16 %v87_v13, %v84_v11  ;;  %v268_v15 = vpop.f32.mrb[3].mxu0 }
  0xde   :  { %286 = vmatmul.mubr.bf16.vlgmr.msra.gmra.mrb[0].mxu1 %v100_v14 }
 0x1b1   :  { %v206_v17 = vpop.f32.mrb[0].mxu1 }
 0x1b2   :  { %v207_v18 = vadd.f32 %v234_v16, %v206_v17  ;;  %v287_v19 = vpop.f32.mrb[1].mxu1 }
 0x1b3   :  { %v209_v20 = vpop.f32.mrb[2].mxu1 }
 0x1b4   :  { %v210_v21 = vadd.f32 %v234_v16, %v209_v20  ;;  %v288_v22 = vpop.f32.mrb[3].mxu1  ;;  %v213_v23 = vmax.f32 %v207_v18, 0.0 }
 0x1b6   :  { %v214_v24 = vmax.f32 %v210_v21, 0.0 }
 0x1b8   :  { %v250_v25 = vpack.c.bf16 %v214_v24, %v213_v23 }
 0x1ba   :  { %251 = vst [vmem:[%s368_s4] sm:$0xff] %v250_v25  }

// kernel: vgae_encoder_forward.3
= control target key start
LH: loop header
LB: loop body
LE: loop exit
PB: predicated region body
PF: predicated region fallthrough
CT: control target
= control target key end

     0   :  { %v318_v0 = vmov 0.0   ;;  %vm319_vm0 = vmmov 0   ;;  %vm46_vm1 = vcmask 130048   ;;  %v320_v19 = vmov 0   ;;  %s415_s1 = inlined_call_operand.vmem [shape: bf16[16,128], index: 1, kind: input, shape index: {}]   ;;  %s416_s0 = inlined_call_operand.vmem [shape: bf16[16,16], index: 0, kind: input, shape index: {}]   ;;  %s417_s2 = inlined_call_operand.vmem [shape: bf16[128,256], index: 2, kind: input, shape index: {}]   ;;  %s418_s3 = inlined_call_operand.vmem [shape: f32[1,256], index: 3, kind: input, shape index: {}]   ;;  %s419_s4 = inlined_call_operand.vmem [shape: f32[16,256], index: 4, kind: output, shape index: {}]  }
   0x1   :  { %283 = vmatprep.subr.bf16.mxu0 %v318_v0  ;;  %v292_v1 = vld [vmem:[%s415_s1] sm:$0xff]   ;;  %285 = vmatprep.mubr.msk.bf16.mxu0 %vm319_vm0, %v318_v0  ;;  %v297_v5 = vld [vmem:[%s417_s2 + $0x14] ss:$8 sps:$4 sm:$0xff]   ;;  %v299_v6 = vld [vmem:[%s417_s2 + $0x10] ss:$8 sps:$4 sm:$0xff]   ;;  %v119_v25 = vlaneseq }
   0x2   :  { %v293_v2 = vld [vmem:[%s416_s0] sm:$0xff]   ;;  %284 = vmatpush3.bf16.msra.mxu0 %v292_v1  ;;  %v303_v9 = vld [vmem:[%s417_s2 + $0x34] ss:$8 sps:$4 sm:$0xff]   ;;  %v305_v10 = vld [vmem:[%s417_s2 + $0x30] ss:$8 sps:$4 sm:$0xff]   ;;  %241 = vmatprep.mubr.bf16.mxu1 %v320_v19 }
   0x3   :  { %v294_v3 = vld [vmem:[%s417_s2 + $0x4] ss:$8 sps:$4 sm:$0xff]   ;;  %v296_v4 = vld [vmem:[%s417_s2] ss:$8 sps:$4 sm:$0xff]   ;;  %v309_v13 = vld [vmem:[%s417_s2 + $0x54] ss:$8 sps:$4 sm:$0xff]  }
   0x4   :  { %209 = vmatprep.subr.bf16.mxu1 %v294_v3  ;;  %v300_v7 = vld [vmem:[%s417_s2 + $0x24] ss:$8 sps:$4 sm:$0xff]   ;;  %v302_v8 = vld [vmem:[%s417_s2 + $0x20] ss:$8 sps:$4 sm:$0xff]   ;;  %v311_v14 = vld [vmem:[%s417_s2 + $0x50] ss:$8 sps:$4 sm:$0xff]  }
   0x5   :  { %286 = vmatmul.mubr.msk.bf16.vlgmr.msra.gmra.mrb[0].mxu0 %vm46_vm1, %v293_v2  ;;  %210 = vmatpush1.bf16.msra.mxu1 %v296_v4  ;;  %v306_v11 = vld [vmem:[%s417_s2 + $0x44] ss:$8 sps:$4 sm:$0xff]   ;;  %v308_v12 = vld [vmem:[%s417_s2 + $0x40] ss:$8 sps:$4 sm:$0xff]   ;;  %v315_v17 = vld [vmem:[%s417_s2 + $0x74] ss:$8 sps:$4 sm:$0xff]  }
   0x6   :  { %211 = vmatprep.subr.bf16.mxu1 %v297_v5  ;;  %v312_v15 = vld [vmem:[%s417_s2 + $0x64] ss:$8 sps:$4 sm:$0xff]   ;;  %v314_v16 = vld [vmem:[%s417_s2 + $0x60] ss:$8 sps:$4 sm:$0xff]   ;;  %v317_v18 = vld [vmem:[%s417_s2 + $0x70] ss:$8 sps:$4 sm:$0xff]  }
   0x7   :  { %v120_v26 = vshrl.u32 %v119_v25, 7  ;;  %v117_v28 = vld [vmem:[%s418_s3] sm:$0x3] }
   0x9   :  { %212 = vmatpush1.bf16.msra.mxu1 %v299_v6  ;;  %v121_v27 = vsub.s32 0, %v120_v26  ;;  %v125_v29 = vsub.s32 1, %v120_v26 }
   0xa   :  { %213 = vmatprep.subr.bf16.mxu1 %v300_v7 }
   0xb   :  { %v122_v30 = vrot.slane %v117_v28, %v121_v27  ;;  %v126_v31 = vrot.slane %v117_v28, %v125_v29 }
   0xd   :  { %214 = vmatpush1.bf16.msra.mxu1 %v302_v8 }
   0xe   :  { %215 = vmatprep.subr.bf16.mxu1 %v303_v9 }
  0x11   :  { %216 = vmatpush1.bf16.msra.mxu1 %v305_v10 }
  0x12   :  { %217 = vmatprep.subr.bf16.mxu1 %v306_v11 }
  0x15   :  { %218 = vmatpush1.bf16.msra.mxu1 %v308_v12 }
  0x16   :  { %219 = vmatprep.subr.bf16.mxu1 %v309_v13 }
  0x19   :  { %220 = vmatpush1.bf16.msra.mxu1 %v311_v14 }
  0x1a   :  { %221 = vmatprep.subr.bf16.mxu1 %v312_v15 }
  0x1d   :  { %222 = vmatpush1.bf16.msra.mxu1 %v314_v16 }
  0x1e   :  { %223 = vmatprep.subr.bf16.mxu1 %v315_v17 }
  0x21   :  { %224 = vmatpush1.bf16.msra.mxu1 %v317_v18 }
  0xd8   :  { %v84_v20 = vpop.f32.mrb[0].mxu0 }
  0xd9   :  { %v287_v21 = vpop.f32.mrb[1].mxu0 }
  0xda   :  { %v87_v22 = vpop.f32.mrb[2].mxu0 }
  0xdb   :  { %v100_v23 = vpack.c.bf16 %v87_v22, %v84_v20  ;;  %v288_v24 = vpop.f32.mrb[3].mxu0 }
  0xdd   :  { %242 = vmatmul.mubr.bf16.vlgmr.msra.gmra.mrb[0].mxu1 %v100_v23 }
 0x1b0   :  { %v243_v32 = vpop.f32.mrb[0].mxu1 }
 0x1b1   :  { %v244_v33 = vadd.f32 %v243_v32, %v122_v30  ;;  %v245_v34 = vpop.f32.mrb[1].mxu1 }
 0x1b2   :  { %v246_v35 = vadd.f32 %v245_v34, %v126_v31  ;;  %v247_v36 = vpop.f32.mrb[2].mxu1 }
 0x1b3   :  { %252 = vst [vmem:[%s419_s4] sm:$0xff] %v244_v33  ;;  %v248_v37 = vadd.f32 %v247_v36, %v122_v30  ;;  %v249_v38 = vpop.f32.mrb[3].mxu1 }
 0x1b4   :  { %253 = vst [vmem:[%s419_s4 + $0x8] sm:$0xff] %v246_v35  ;;  %v250_v39 = vadd.f32 %v249_v38, %v126_v31 }
 0x1b5   :  { %254 = vst [vmem:[%s419_s4 + $0x10] sm:$0xff] %v248_v37 }
 0x1b6   :  { %255 = vst [vmem:[%s419_s4 + $0x18] sm:$0xff] %v250_v39 }

</bundles_post_ra>
